<compile_context>
chip_gen: v7x
topology: tpu7x:2x2x1
jax: 0.10.0
libtpu: 0.0.40
codegen_flags: <defaults>
</compile_context>

<pallas_src>
import numpy as np
from functools import partial

import jax
import jax.numpy as jnp
from jax import lax
from jax.experimental import pallas as pl
from jax.experimental.pallas import tpu as pltpu


def _round_up(x, m):
    return ((x + m - 1) // m) * m


# ----------------------------------------------------------------------------
# Pallas kernel: mask reductions + in-mask test + fused compaction key.
# Output: (N, K_pad) int32 keys; valid keypoint slots keep their flat index
# b*K_pad+k, rejected / pad slots get flat index + N*K_pad (always larger).
# ----------------------------------------------------------------------------
def _make_key_kernel(coarse_downscale, n, k_pad):
    ds = np.int32(coarse_downscale)
    big = np.int32(n * k_pad)

    def kernel(mask_ref, kxy_ref, key_ref):
        # mask arrives int8; reduce in int32 (no float unpack needed).
        m = mask_ref[...].astype(jnp.int32)                          # (N, Hc, Wc)
        vw = jnp.sum(jnp.max(m, axis=1), axis=1, keepdims=True)      # (N, 1) valid cols
        vh = jnp.sum(jnp.max(m, axis=2), axis=1, keepdims=True)      # (N, 1) valid rows
        # floor(k / ds) < v - 1   <=>   k < (v - 1) * ds   (k >= 0, integer v/ds)
        tx = ((vw - 1) * ds).astype(jnp.float32)                     # (N, 1)
        ty = ((vh - 1) * ds).astype(jnp.float32)                     # (N, 1)

        kxy = kxy_ref[...]                                           # (N, 2, K_pad)
        kx = kxy[:, 0, :]                                            # (N, K_pad)
        ky = kxy[:, 1, :]
        inm = jnp.logical_and(kx < tx, ky < ty)                      # (N, K_pad)

        bidx = lax.broadcasted_iota(jnp.int32, (n, k_pad), 0)
        kidx = lax.broadcasted_iota(jnp.int32, (n, k_pad), 1)
        gidx = bidx * np.int32(k_pad) + kidx                         # flat slot index
        # Monotone compaction key (invalid/pad -> flat index + N*K_pad, per the
        # review's correctness note: offset spans the PADDED width).
        key_ref[...] = jnp.where(inm, gidx, gidx + big)

    return kernel


def detector_keys_pallas(mask0_i8, kxy, coarse_downscale):
    """mask0_i8: (N, Hc, Wc) int8; kxy: (N, 2, K_pad) f32.
    Returns (N, K_pad) int32 compaction keys."""
    N, _, K_pad = kxy.shape
    Hc, Wc = mask0_i8.shape[1], mask0_i8.shape[2]
    cost = pl.CostEstimate(
        flops=int(N * (Hc * Wc * 3 + K_pad * 8)),
        transcendentals=0,
        bytes_accessed=int(mask0_i8.size + kxy.size * 4 + N * K_pad * 4),
    )
    vmem = pl.BlockSpec(memory_space=pltpu.MemorySpace.VMEM)
    # TODO(synk): at production N/K on v7x, add grid=(N,) with
    # dimension_semantics=("parallel",) so the 2 TensorCores split the batch,
    # and tile (1, Hc, Wc)/(1, 2, K_pad) blocks instead of whole-array VMEM
    # (v7x only has 64 MiB VMEM). At toy N=2 the ~0.35us/step grid overhead
    # outweighs any benefit, so the kernel stays gridless here.
    return pl.pallas_call(
        _make_key_kernel(coarse_downscale, N, K_pad),
        out_shape=jax.ShapeDtypeStruct((N, K_pad), jnp.int32),
        in_specs=[vmem, vmem],
        out_specs=vmem,
        cost_estimate=cost,
    )(mask0_i8, kxy)


# ----------------------------------------------------------------------------
# Device-side global compaction: Pallas key kernel + one argsort/gather over
# the flattened (N*K_pad) slots. Valid keypoints of image 0 come first (in
# original order), then image 1, ...; rejected + pad slots sort past the end.
# b_ids fall straight out of the gathered order (order // K_pad).
# TODO(synk): an in-kernel prefix-sum + scatter could replace the argsort at
# very large K; at these sizes the single small argsort is cheaper and simpler.
# ----------------------------------------------------------------------------
@partial(jax.jit, static_argnums=(3,))
def _compact_device(mask0, kpts, scores, coarse_downscale):
    N, K, _ = kpts.shape
    K_pad = max(128, _round_up(K, 128))            # lane-dense last dim
    pad = K_pad - K
    # Pad ONCE; pad coordinates = 1e9 so pad slots always fail the test.
    kpts_pad = jnp.pad(kpts.astype(jnp.float32), ((0, 0), (0, pad), (0, 0)),
                       constant_values=np.float32(1e9))              # (N, K_pad, 2)
    scores_pad = jnp.pad(scores.astype(jnp.float32), ((0, 0), (0, pad)))
    kxy = jnp.transpose(kpts_pad, (0, 2, 1))                         # (N, 2, K_pad)

    keys = detector_keys_pallas(mask0.astype(jnp.int8), kxy, coarse_downscale)

    keys_flat = keys.reshape(N * K_pad)
    order = jnp.argsort(keys_flat)                 # unique keys -> stable by value
    kpts_c = jnp.take(kpts_pad.reshape(N * K_pad, 2), order, axis=0)
    scores_c = jnp.take(scores_pad.reshape(N * K_pad), order, axis=0)
    bids_c = (order // K_pad).astype(jnp.int32)
    total = jnp.sum(keys_flat < N * K_pad).astype(jnp.int32)
    return kpts_c, scores_c, bids_c, total


# ----------------------------------------------------------------------------
# Synthetic deterministic "detector" (stands in for the external SuperPoint/
# SIFT submodule passed to DetectorWrapper.__init__).
# TODO(synk): the real detector is an external network, not part of this
# module; replaced with deterministic synthetic keypoints/scores.
# ----------------------------------------------------------------------------
def make_synthetic_detector(key, num_kpts):
    def detector(image_nchw):
        N, _, H, W = image_nchw.shape
        k1, k2, k3 = jax.random.split(key, 3)
        kx = jnp.floor(jax.random.uniform(k1, (N, num_kpts)) * W)    # x in [0, W)
        ky = jnp.floor(jax.random.uniform(k2, (N, num_kpts)) * H)    # y in [0, H)
        scores = jax.random.uniform(k3, (N, num_kpts))
        return {'keypoints': jnp.stack([kx, ky], axis=-1),           # (N, K, 2)
                'scores': scores}                                    # (N, K)
    return detector


# ----------------------------------------------------------------------------
# DetectorWrapper forward (Pallas-backed)
# ----------------------------------------------------------------------------
class DetectorWrapperPallas:
    def __init__(self, detector=None, detector_type='SuperPoint'):
        assert detector_type in ['OnGrid', 'SuperPoint', 'SuperPointEC', 'SIFT'] \
            or 'and grid' in detector_type
        self.detector_type = detector_type
        self.detector = detector
        # TODO(synk): save_keypoints / read_keypoints h5py file I/O paths omitted.

    def __call__(self, batch):
        if self.detector_type == 'OnGrid':
            batch.update({'detector_type': self.detector_type})
            return batch

        ret = self.detector(batch['image0'])       # {'keypoints': (N,K,2), 'scores': (N,K)}
        kpts = ret['keypoints']
        scores = ret['scores']
        N, K, _ = kpts.shape

        if 'mask0' in batch:
            ds = batch['image0'].shape[-1] // batch['mask0'].shape[-1]
            kpts_c, scores_c, bids_c, total = _compact_device(
                batch['mask0'], kpts, scores, ds)
            # Single scalar D2H sync (the ragged output length is inherently
            # data-dependent); all compacted data stays resident on device —
            # no host concat, no re-upload.
            M = int(jax.device_get(total))
            kpts0 = kpts_c[:M]
            scores0 = scores_c[:M]
            bids = bids_c[:M]
        else:
            kpts0 = kpts.reshape(N * K, 2)
            scores0 = scores.reshape(N * K)
            bids = jnp.repeat(jnp.arange(N, dtype=jnp.int32), K)

        batch.update({
            'detector_kpts0': kpts0,
            'detector_scores0': scores0,
            'detector_b_ids': bids,
        })
        batch.update({'detector_type': self.detector_type})
        return batch


# ----------------------------------------------------------------------------
# main
# ----------------------------------------------------------------------------
if __name__ == "__main__":
    key = jax.random.PRNGKey(0)
    N, H, W = 2, 64, 64
    Hc, Wc = 8, 8            # coarse_downscale = 64 // 8 = 8
    K = 8

    image0 = jax.random.normal(key, (N, 1, H, W), dtype=jnp.float32)

    mask0_np = np.zeros((N, Hc, Wc), dtype=np.int8)
    mask0_np[0, :6, :7] = 1      # image 0: 6 valid rows, 7 valid cols
    mask0_np[1, :8, :5] = 1      # image 1: 8 valid rows, 5 valid cols
    mask0 = jnp.asarray(mask0_np)     # int8 — no f32 upcast anywhere

    detector = make_synthetic_detector(jax.random.PRNGKey(1), K)
    wrapper = DetectorWrapperPallas(detector=detector, detector_type='SuperPoint')

    batch = {'image0': image0, 'mask0': mask0}
    wrapper(batch)
    jax.block_until_ready(batch['detector_kpts0'])

    # ---------------- correctness check vs. a pure numpy reference ----------
    ret = detector(image0)
    kpts_np = np.asarray(ret['keypoints'])
    scores_np = np.asarray(ret['scores'])
    kx = kpts_np[..., 0]
    ky = kpts_np[..., 1]
    m = np.asarray(mask0, dtype=np.float32)
    ds = W // Wc
    vw_ref = m.max(axis=1).sum(axis=1)
    vh_ref = m.max(axis=2).sum(axis=1)
    inm_ref = (np.floor(kx / ds) < vw_ref[:, None] - 1) & \
              (np.floor(ky / ds) < vh_ref[:, None] - 1)

    kpts0_ref = np.concatenate([kpts_np[i][inm_ref[i]] for i in range(N)], axis=0)
    scores0_ref = np.concatenate([scores_np[i][inm_ref[i]] for i in range(N)], axis=0)
    bids_ref = np.concatenate(
        [np.full((int(inm_ref[i].sum()),), i) for i in range(N)], axis=0)

    kpts0_out = np.asarray(jax.block_until_ready(batch['detector_kpts0']))
    scores0_out = np.asarray(batch['detector_scores0'])
    bids_out = np.asarray(batch['detector_b_ids'])

    assert kpts0_out.shape == (int(inm_ref.sum()), 2), "wrong compacted shape"
    assert np.allclose(kpts0_out, kpts0_ref), "kpts0 mismatch"
    assert np.allclose(scores0_out, scores0_ref), "scores0 mismatch"
    assert np.array_equal(bids_out, bids_ref.astype(np.int32)), "b_ids mismatch"
    assert batch['detector_type'] == 'SuperPoint'

    print("KERNEL_OK")
</pallas_src>

<mosaic_0001>
module attributes {stable_mosaic.version = 11 : i64} {
  func.func @kernel(%arg0: memref<2x8x8xi8, #tpu.memory_space<vmem>>, %arg1: memref<2x2x128xf32, #tpu.memory_space<vmem>>, %arg2: memref<2x128xi32, #tpu.memory_space<vmem>>) attributes {dimension_semantics = [], scalar_prefetch = 0 : i64, scratch_operands = 0 : i64, tpu.core_type = #tpu.core_type<tc>} {
    %c0 = arith.constant 0 : index
    %c0_0 = arith.constant 0 : index
    %c0_1 = arith.constant 0 : index
    %0 = vector.load %arg0[%c0, %c0_0, %c0_1] : memref<2x8x8xi8, #tpu.memory_space<vmem>>, vector<2x8x8xi8>
    %1 = arith.extsi %0 : vector<2x8x8xi8> to vector<2x8x8xi32>
    %cst = arith.constant dense<-2147483648> : vector<2x8xi32>
    %2 = vector.multi_reduction <maxsi>, %1, %cst [1] : vector<2x8x8xi32> to vector<2x8xi32>
    %cst_2 = arith.constant dense<0> : vector<2xi32>
    %3 = vector.multi_reduction <add>, %2, %cst_2 [1] : vector<2x8xi32> to vector<2xi32>
    %4 = vector.shape_cast %3 : vector<2xi32> to vector<2x1xi32>
    %cst_3 = arith.constant dense<-2147483648> : vector<2x8xi32>
    %5 = vector.multi_reduction <maxsi>, %1, %cst_3 [2] : vector<2x8x8xi32> to vector<2x8xi32>
    %cst_4 = arith.constant dense<0> : vector<2xi32>
    %6 = vector.multi_reduction <add>, %5, %cst_4 [1] : vector<2x8xi32> to vector<2xi32>
    %7 = vector.shape_cast %6 : vector<2xi32> to vector<2x1xi32>
    %c1_i32 = arith.constant 1 : i32
    %8 = vector.broadcast %c1_i32 : i32 to vector<2x1xi32>
    %9 = arith.subi %4, %8 : vector<2x1xi32>
    %c8_i32 = arith.constant 8 : i32
    %10 = vector.broadcast %c8_i32 : i32 to vector<2x1xi32>
    %11 = arith.muli %9, %10 : vector<2x1xi32>
    %12 = arith.sitofp %11 : vector<2x1xi32> to vector<2x1xf32>
    %c1_i32_5 = arith.constant 1 : i32
    %13 = vector.broadcast %c1_i32_5 : i32 to vector<2x1xi32>
    %14 = arith.subi %7, %13 : vector<2x1xi32>
    %c8_i32_6 = arith.constant 8 : i32
    %15 = vector.broadcast %c8_i32_6 : i32 to vector<2x1xi32>
    %16 = arith.muli %14, %15 : vector<2x1xi32>
    %17 = arith.sitofp %16 : vector<2x1xi32> to vector<2x1xf32>
    %c0_7 = arith.constant 0 : index
    %c0_8 = arith.constant 0 : index
    %c0_9 = arith.constant 0 : index
    %18 = vector.load %arg1[%c0_7, %c0_8, %c0_9] : memref<2x2x128xf32, #tpu.memory_space<vmem>>, vector<2x2x128xf32>
    %19 = vector.extract_strided_slice %18 {offsets = [0, 0, 0], sizes = [2, 1, 128], strides = [1, 1, 1]} : vector<2x2x128xf32> to vector<2x1x128xf32>
    %20 = vector.shape_cast %19 : vector<2x1x128xf32> to vector<2x128xf32>
    %21 = vector.extract_strided_slice %18 {offsets = [0, 1, 0], sizes = [2, 1, 128], strides = [1, 1, 1]} : vector<2x2x128xf32> to vector<2x1x128xf32>
    %22 = vector.shape_cast %21 : vector<2x1x128xf32> to vector<2x128xf32>
    %23 = vector.broadcast %12 : vector<2x1xf32> to vector<2x128xf32>
    %24 = arith.cmpf olt, %20, %23 : vector<2x128xf32>
    %25 = vector.broadcast %17 : vector<2x1xf32> to vector<2x128xf32>
    %26 = arith.cmpf olt, %22, %25 : vector<2x128xf32>
    %27 = arith.andi %24, %26 : vector<2x128xi1>
    %28 = tpu.iota {dimensions = array<i32: 0>} : vector<2x128xi32>
    %29 = tpu.iota {dimensions = array<i32: 1>} : vector<2x128xi32>
    %c128_i32 = arith.constant 128 : i32
    %30 = vector.broadcast %c128_i32 : i32 to vector<2x128xi32>
    %31 = arith.muli %28, %30 : vector<2x128xi32>
    %32 = arith.addi %31, %29 : vector<2x128xi32>
    %c256_i32 = arith.constant 256 : i32
    %33 = vector.broadcast %c256_i32 : i32 to vector<2x128xi32>
    %34 = arith.addi %32, %33 : vector<2x128xi32>
    %35 = arith.select %27, %32, %34 : vector<2x128xi1>, vector<2x128xi32>
    %c0_10 = arith.constant 0 : index
    %c0_11 = arith.constant 0 : index
    %36 = vector.load %arg2[%c0_10, %c0_11] : memref<2x128xi32, #tpu.memory_space<vmem>>, vector<2x128xi32>
    tpu.vector_store %arg2[%c0_10, %c0_11], %35 {strides = array<i32>} : memref<2x128xi32, #tpu.memory_space<vmem>>, vector<2x128xi32>,
    return
  }
}

</mosaic_0001>

<bundles_post_ra>
// kernel: _compact_device.1
= control target key start
LH: loop header
LB: loop body
LE: loop exit
PB: predicated region body
PF: predicated region fallthrough
CT: control target
= control target key end

     0   :  { %vm15_vm0 = vcmask 64512   ;;  %v80_v9 = vlaneseq  ;;  %vm36_vm7 = vcmask 1041409   ;;  %vm38_vm8 = vcmask 58368   ;;  %s193_s0 = inlined_call_operand.vmem [shape: s8[2,8,8], index: 0, kind: input, shape index: {}]   ;;  %s194_s1 = inlined_call_operand.vmem [shape: f32[2,2,128], index: 1, kind: input, shape index: {}]   ;;  %s195_s2 = inlined_call_operand.vmem [shape: s32[2,128], index: 2, kind: output, shape index: {}]  }
   0x1   :  { %v151_v0 = vld [vmem:[%s193_s0] sm:$0xf]  }
   0x2   :  { %v152_v1 = vunpack.c.0.s8 %v151_v0  ;;  %v153_v2 = vunpack.c.1.s8 %v151_v0  ;;  %v83_v10 = vshrl.u32 %v80_v9, 7  ;;  %v81_v11 = vand.u32 127, %v80_v9 }
   0x4   :  { %v16_v3 = vsel %vm15_vm0, %v152_v1, 2147483648  ;;  %v26_v4 = vsel %vm15_vm0, %v153_v2, 2147483648  ;;  %v134_v12 = vmul.u32 128, %v83_v10  ;;  %v84_v47 = vsub.s32 %v81_v11, %v83_v10 }
   0x5   :  { %v53_v5 = vshra.s32 %v16_v3, 16  ;;  %v67_v6 = vshra.s32 %v26_v4, 16  ;;  %v52_v14 = vand.u32 65535, %v16_v3  ;;  %v66_v16 = vand.u32 65535, %v26_v4 }
   0x6   :  { %v174_v13 = vadd.s32 %v134_v12, %v81_v11  ;;  %v17_v22 = vrot.slane %v16_v3, 4  ;;  %v27_v23 = vrot.slane %v26_v4, 4  ;;  %v111_v12 = vld [vmem:[%s194_s1 + $0x2] sm:$0x3] }
   0x7   :  { %v55_v7 = vcvt.s32.f32 %v53_v5  ;;  %v69_v8 = vcvt.s32.f32 %v67_v6  ;;  %v54_v15 = vcvt.s32.f32 %v52_v14  ;;  %v68_v19 = vcvt.s32.f32 %v66_v16 }
   0x8   :  { %vm18_vm3 = vcmp.gt.s32.totalorder %v16_v3, %v17_v22  ;;  %vm28_vm4 = vcmp.gt.s32.totalorder %v26_v4, %v27_v23 }
   0x9   :  { %56 = vmax.xlane.f32.xlu0 %v55_v7  ;;  %v19_v24 = vsel %vm18_vm3, %v16_v3, %v17_v22  ;;  %v29_v25 = vsel %vm28_vm4, %v26_v4, %v27_v23  ;;  %v137_v22 = vrot.slane %v174_v13, 1 }
   0xa   :  { %v20_v26 = vrot.slane %v19_v24, 2  ;;  %v30_v27 = vrot.slane %v29_v25, 2 }
   0xc   :  { %vm21_vm5 = vcmp.gt.s32.totalorder %v19_v24, %v20_v26  ;;  %vm31_vm6 = vcmp.gt.s32.totalorder %v29_v25, %v30_v27 }
   0xd   :  { %70 = vmax.xlane.f32.xlu0 %v69_v8  ;;  %v22_v28 = vsel %vm21_vm5, %v19_v24, %v20_v26  ;;  %v32_v29 = vsel %vm31_vm6, %v29_v25, %v30_v27 }
   0xe   :  { %v23_v30 = vrot.slane %v22_v28, 1  ;;  %v33_v31 = vrot.slane %v32_v29, 1 }
  0x10   :  { %vm24_vm9 = vcmp.gt.s32.totalorder %v22_v28, %v23_v30  ;;  %vm34_vm10 = vcmp.gt.s32.totalorder %v32_v29, %v33_v31 }
  0x11   :  { %v25_v32 = vsel %vm24_vm9, %v22_v28, %v23_v30  ;;  %v35_v33 = vsel %vm34_vm10, %v32_v29, %v33_v31 }
  0x12   :  { %v37_v34 = vsel %vm36_vm7, %v35_v33, %v25_v32 }
  0x13   :  { %v39_v35 = vsel %vm38_vm8, %v37_v34, 0 }
  0x14   :  { %v41_v36 = vshrl.u32 %v39_v35, 16  ;;  %v40_v38 = vand.u32 65535, %v39_v35 }
  0x16   :  { %v43_v37 = vcvt.s32.f32 %v41_v36  ;;  %v42_v39 = vcvt.s32.f32 %v40_v38 }
  0x96   :  { %v57_v17 = vpop.xlane.xlu0 %56 }
  0x97   :  { %vm58_vm1 = vcmp.eq.f32.partialorder %v55_v7, %v57_v17  ;;  %v63_v40 = vcvt.f32.s32 %v57_v17 }
  0x98   :  { %v59_v18 = vsel %vm58_vm1, %v54_v15, -inf  ;;  %v136_v15 = vadd.s32 256, %v174_v13 }
  0x99   :  { %60 = vmax.xlane.f32.xlu1 %v59_v18  ;;  %v64_v44 = vshll.u32 %v63_v40, 16  ;;  %v155_v18 = vmov 0  }
  0x9a   :  { %v71_v20 = vpop.xlane.xlu0 %70  ;;  %v138_v23 = vrot.slane %v136_v15, 1 }
  0x9b   :  { %vm72_vm2 = vcmp.eq.f32.partialorder %v69_v8, %v71_v20  ;;  %v77_v42 = vcvt.f32.s32 %v71_v20  ;;  %v110_v20 = vld [vmem:[%s194_s1] sm:$0x3] }
  0x9c   :  { %v73_v21 = vsel %vm72_vm2, %v68_v19, -inf }
  0x9d   :  { %74 = vmax.xlane.f32.xlu1 %v73_v21  ;;  %v78_v46 = vshll.u32 %v77_v42, 16 }
  0xa1   :  { %46 = vadd.xlane.f32.xlu1 %v43_v37 }
  0xa5   :  { %44 = vadd.xlane.f32.xlu1 %v42_v39 }
 0x126   :  { %v61_v41 = vpop.xlane.xlu1 %60 }
 0x127   :  { %v62_v43 = vcvt.f32.s32 %v61_v41 }
 0x129   :  { %v65_v48 = vadd.s32 %v64_v44, %v62_v43 }
 0x12a   :  { %v75_v45 = vpop.xlane.xlu1 %74 }
 0x12b   :  { %v76_v49 = vcvt.f32.s32 %v75_v45  ;;  %v85_v51 = vrot.slane %v65_v48, %v84_v47 }
 0x12d   :  { %v79_v50 = vadd.s32 %v78_v46, %v76_v49 }
 0x12e   :  { %v47_v59 = vpop.xlane.xlu1 %46 }
 0x12f   :  { %v89_v52 = vrot.slane %v79_v50, %v84_v47  ;;  %v49_v60 = vcvt.f32.s32 %v47_v59 }
 0x131   :  { %v90_v53 = vsel %vm36_vm7, %v89_v52, %v85_v51  ;;  %v50_v62 = vshll.u32 %v49_v60, 16 }
 0x132   :  { %v91_v54 = vsel %vm38_vm8, %v90_v53, 0  ;;  %v45_v61 = vpop.xlane.xlu1 %44 }
 0x133   :  { %v93_v55 = vshrl.u32 %v91_v54, 16  ;;  %v92_v57 = vand.u32 65535, %v91_v54  ;;  %v48_v63 = vcvt.f32.s32 %v45_v61 }
 0x135   :  { %v95_v56 = vcvt.s32.f32 %v93_v55  ;;  %v94_v58 = vcvt.s32.f32 %v92_v57  ;;  %v51_v0 = vadd.s32 %v50_v62, %v48_v63 }
 0x137   :  { %98 = vadd.xlane.f32.xlu0 %v95_v56  ;;  %v148_v3 = vadd.s32 4294967295, %v51_v0 }
 0x139   :  { %v105_v8 = vmul.u32 8, %v148_v3 }
 0x13b   :  { %96 = vadd.xlane.f32.xlu0 %v94_v58  ;;  %v106_v11 = vcvt.s32.f32 %v105_v8 }
 0x13d   :  { %v113_v17 = vrot.slane %v106_v11, 1  ;;  %vm116_vm1 = vcmp.lt.f32.partialorder %v110_v20, %v106_v11 }
 0x13f   :  { %vm117_vm14 = vcmp.lt.f32.partialorder %v111_v12, %v113_v17 }
 0x1c4   :  { %v99_v1 = vpop.xlane.xlu0 %98 }
 0x1c5   :  { %v101_v2 = vcvt.f32.s32 %v99_v1 }
 0x1c7   :  { %v102_v5 = vshll.u32 %v101_v2, 16 }
 0x1c8   :  { %v97_v4 = vpop.xlane.xlu0 %96 }
 0x1c9   :  { %v100_v6 = vcvt.f32.s32 %v97_v4 }
 0x1cb   :  { %v103_v7 = vadd.s32 %v102_v5, %v100_v6 }
 0x1cd   :  { %v149_v9 = vadd.s32 4294967295, %v103_v7 }
 0x1cf   :  { %v108_v10 = vmul.u32 8, %v149_v9 }
 0x1d1   :  { %v109_v14 = vcvt.s32.f32 %v108_v10 }
 0x1d3   :  { %v119_v16 = vrot.slane %v109_v14, 7  ;;  %vm123_vm11 = vcmp.lt.f32.partialorder %v111_v12, %v109_v14 }
 0x1d4   :  { %v125_v19 = vsel %vm123_vm11, 1, %v155_v18 }
 0x1d5   :  { %v127_v21 = vrot.slane %v125_v19, 1  ;;  %vm122_vm12 = vcmp.lt.f32.partialorder %v110_v20, %v119_v16 }
 0x1d6   :  { %v124_v24 = vsel %vm122_vm12, 1, %v155_v18 }
 0x1d7   :  { %vm129_vm13 = vcmp.ne.s32.totalorder %v127_v21, 0  ;;  %v126_v25 = vrot.slane %v124_v24, 1 }
 0x1d8   :  { %vm131_vm15 = vmand %vm117_vm14, %vm129_vm13 }
 0x1d9   :  { %vm128_vm0 = vcmp.ne.s32.totalorder %v126_v25, 0  ;;  %v140_v26 = vsel %vm131_vm15, %v137_v22, %v138_v23 }
 0x1da   :  { %vm130_vm2 = vmand %vm116_vm1, %vm128_vm0  ;;  %v141_v27 = vrot.slane %v140_v26, 7 }
 0x1db   :  { %v139_v28 = vsel %vm130_vm2, %v174_v13, %v136_v15 }
 0x1dc   :  { %v142_v29 = vsel %vm36_vm7, %v141_v27, %v139_v28 }
 0x1dd   :  { %143 = vst [vmem:[%s195_s2] sm:$0x3] %v142_v29 }

</bundles_post_ra>
